<compile_context>
chip_gen: v6e
topology: v6e:2x2x1
jax: 0.10.0
libtpu: 0.0.40
codegen_flags: <defaults>
</compile_context>

<pallas_src>
import functools

import jax
import jax.numpy as jnp
from jax.experimental import pallas as pl
from jax.experimental.pallas import tpu as pltpu

_LANES = 128
_MAX_TILE_ROWS = 4096            # keeps lane-padded (tn, 1) intermediates small
_TARGET_TILE_BYTES = 4 * 1024 * 1024   # ~4 MiB pred tile per grid step


def _round_up(x, m):
    return ((x + m - 1) // m) * m


def _vmem_budget_bytes():
    """~75% of physical VMEM: ~48 MiB on v7x, ~96 MiB on v5e/v6e."""
    cap = 64 * 1024 * 1024
    try:
        info = pltpu.get_tpu_info()
        cap = int(getattr(info, "vmem_capacity_bytes", cap)) or cap
    except Exception:
        pass
    return (cap * 3) // 4


def _accuracy_kernel(thr_ref, pred_ref, target_ref, out_ref, acc_ref, *,
                     tiles_per_shard, num_rows, need_mask):
    """Per-tile top-k rank computation + fused integer hit-count accumulation."""
    p = pl.program_id(0)   # row shard (parallel -> one per v7x TensorCore)
    i = pl.program_id(1)   # row tile within the shard (arbitrary / reduction)

    @pl.when(i == 0)
    def _():
        acc_ref[...] = jnp.zeros_like(acc_ref)

    pred = pred_ref[...]               # (TN, C), native dtype
    tgt = target_ref[...]              # (TN, 1) int32
    tn, c = pred.shape

    col = jax.lax.broadcasted_iota(jnp.int32, (tn, c), dimension=1)

    # Score of the target class for each row (exactly one nonzero per row,
    # so the sum is exact in any float dtype).
    onehot = col == tgt
    tgt_score = jnp.sum(jnp.where(onehot, pred, jnp.zeros_like(pred)),
                        axis=1, keepdims=True)                         # (TN, 1)

    # torch.topk rank of the target class (ties broken by lower class index):
    #   rank = #{j : pred[j] > s} + #{j : pred[j] == s and j < target}
    beats = (pred > tgt_score) | ((pred == tgt_score) & (col < tgt))
    rank = jnp.sum(beats.astype(jnp.int32), axis=1, keepdims=True)     # (TN, 1)

    # Fused per-k hit test: threshold lanes beyond num_k are 0 -> never hit.
    hits = rank < thr_ref[...]                                         # (TN, 128)

    if need_mask:
        # Mask rows of a partial final block / duplicated (clamped) tail block.
        row = jax.lax.broadcasted_iota(jnp.int32, (tn, 1), dimension=0)
        global_row = (p * tiles_per_shard + i) * tn + row
        hits = hits & (global_row < num_rows)

    acc_ref[...] += jnp.sum(hits.astype(jnp.int32), axis=0, keepdims=True)

    @pl.when(i == pl.num_programs(1) - 1)
    def _():
        out_ref[...] = acc_ref[...]


def accuracy_pallas(pred, target, topk=(1,), tile_rows=None):
    """Pallas equivalent of the Accuracy module's forward pass.

    Args:
      pred:      (N, C) float array of class scores (kept in native dtype).
      target:    (N,) int array of ground-truth class indices in [0, C).
      topk:      int or tuple of k values.
      tile_rows: optional batch-tile override (None -> adaptive sizing).

    Returns:
      scalar float32 (if topk is an int) or list of scalars (accuracy in %).
    """
    return_single = isinstance(topk, int)
    topk = (int(topk),) if return_single else tuple(int(k) for k in topk)
    num_k = len(topk)
    assert 1 <= num_k <= _LANES, "at most 128 topk values supported"

    n, c = pred.shape
    itemsize = jnp.dtype(pred.dtype).itemsize
    budget = _vmem_budget_bytes()

    # --- adaptive row-tile sizing (bandwidth-bound streaming reduction) ----
    # Per-row VMEM cost model: double-buffered pred + target blocks, plus a
    # generous allowance for in-kernel intermediates (iota/beats/rank/hits).
    pred_row_buf = _round_up(c, _LANES) * itemsize      # lane-padded pred row
    tgt_row_buf = 512                                   # (tn,1) i32, lane-padded
    per_row = (2 * (pred_row_buf + tgt_row_buf)
               + _round_up(c, _LANES) * 4               # one f32-wide temp
               + 6 * 512)                               # column temps
    max_rows_vmem = max(8, (budget - 8 * 1024 * 1024) // per_row)

    if tile_rows is None:
        tn = _TARGET_TILE_BYTES // max(1, c * itemsize)
    else:
        tn = int(tile_rows)
    tn = min(tn, _MAX_TILE_ROWS, max_rows_vmem, _round_up(n, 8))
    tn = max(8, (tn // 8) * 8)

    total_blocks = -(-n // tn)
    num_shards = 2 if total_blocks >= 2 else 1          # both v7x TensorCores
    tiles_per_shard = -(-total_blocks // num_shards)
    need_mask = (n % tn != 0) or (num_shards * tiles_per_shard != total_blocks)
    last_block = total_blocks - 1

    # No jnp.pad of pred/target: partial final block is masked in-kernel.
    target_2d = target.reshape(n, 1).astype(jnp.int32)
    thr = jnp.zeros((1, _LANES), jnp.int32).at[0, :num_k].set(
        jnp.array(topk, jnp.int32))

    def row_block(p, i):
        # Clamp the overflow tile of the second shard onto the last real block
        # (its rows are fully masked out by `need_mask`).
        return jnp.minimum(p * tiles_per_shard + i, last_block)

    # Explicit VMEM request: double-buffered blocks + intermediates + headroom.
    vmem_limit = int(min(budget,
                         max(16 * 1024 * 1024, tn * per_row + 4 * 1024 * 1024)))

    kernel = functools.partial(_accuracy_kernel,
                               tiles_per_shard=tiles_per_shard,
                               num_rows=n,
                               need_mask=need_mask)

    out = pl.pallas_call(
        kernel,
        out_shape=jax.ShapeDtypeStruct((1, num_shards * _LANES), jnp.int32),
        grid_spec=pltpu.PrefetchScalarGridSpec(
            num_scalar_prefetch=0,
            grid=(num_shards, tiles_per_shard),
            in_specs=[
                pl.BlockSpec((1, _LANES), lambda p, i: (0, 0)),            # topk thresholds
                pl.BlockSpec((tn, c), lambda p, i: (row_block(p, i), 0)),  # pred tile
                pl.BlockSpec((tn, 1), lambda p, i: (row_block(p, i), 0)),  # target tile
            ],
            out_specs=pl.BlockSpec((1, _LANES), lambda p, i: (0, p)),
            scratch_shapes=[pltpu.VMEM((1, _LANES), jnp.int32)],
        ),
        compiler_params=pltpu.CompilerParams(
            dimension_semantics=("parallel", "arbitrary"),
            vmem_limit_bytes=vmem_limit,
        ),
    )(thr, pred, target_2d)

    counts = out.reshape(num_shards, _LANES)[:, :num_k].sum(axis=0)
    accs = counts.astype(jnp.float32) * jnp.float32(100.0 / n)
    res = [accs[i] for i in range(num_k)]
    return res[0] if return_single else res


def _accuracy_reference(pred, target, topk=(1,)):
    """Pure-JAX reference matching torch-style accuracy()."""
    n = pred.shape[0]
    pred = pred.astype(jnp.float32)
    tgt_score = jnp.take_along_axis(pred, target[:, None].astype(jnp.int32), axis=1)
    col = jnp.arange(pred.shape[1])[None, :]
    rank = (jnp.sum(pred > tgt_score, axis=1)
            + jnp.sum((pred == tgt_score) & (col < target[:, None]), axis=1))
    return [jnp.sum(rank < k).astype(jnp.float32) * (100.0 / n) for k in topk]


if __name__ == "__main__":
    key = jax.random.PRNGKey(0)
    topk = (1, 5)

    # Test 1: small single-tile case, adaptive tiling, f32.
    k1, k2 = jax.random.split(key)
    N, C = 8, 32
    pred = jax.random.normal(k1, (N, C), dtype=jnp.float32)
    target = jax.random.randint(k2, (N,), 0, C, dtype=jnp.int32)
    accs = [jax.block_until_ready(a) for a in accuracy_pallas(pred, target, topk)]
    refs = _accuracy_reference(pred, target, topk)
    for a, r in zip(accs, refs):
        assert abs(float(a) - float(r)) < 1e-4, (float(a), float(r))

    # Test 2: multi-tile accumulation across two row shards (3 tiles of 8 rows,
    # exercising the clamped/duplicated overflow tile + mask).
    k3, k4 = jax.random.split(k1)
    N2, C2 = 24, 32
    pred2 = jax.random.normal(k3, (N2, C2), dtype=jnp.float32)
    target2 = jax.random.randint(k4, (N2,), 0, C2, dtype=jnp.int32)
    accs2 = [jax.block_until_ready(a)
             for a in accuracy_pallas(pred2, target2, topk, tile_rows=8)]
    refs2 = _accuracy_reference(pred2, target2, topk)
    for a, r in zip(accs2, refs2):
        assert abs(float(a) - float(r)) < 1e-4, (float(a), float(r))

    # Test 3: ragged N (partial final block, no wrapper-side padding) + bf16.
    k5, k6 = jax.random.split(k3)
    N3, C3 = 13, 32
    pred3 = jax.random.normal(k5, (N3, C3), dtype=jnp.float32).astype(jnp.bfloat16)
    target3 = jax.random.randint(k6, (N3,), 0, C3, dtype=jnp.int32)
    accs3 = [jax.block_until_ready(a)
             for a in accuracy_pallas(pred3, target3, topk, tile_rows=8)]
    refs3 = _accuracy_reference(pred3.astype(jnp.float32), target3, topk)
    for a, r in zip(accs3, refs3):
        assert abs(float(a) - float(r)) < 1e-4, (float(a), float(r))

    print("KERNEL_OK")
</pallas_src>

<mosaic_0001>
module attributes {stable_mosaic.version = 11 : i64} {
  func.func @_accuracy_kernel(%arg0: i32, %arg1: i32, %arg2: memref<1x128xi32, #tpu.memory_space<vmem>>, %arg3: memref<8x32xf32, #tpu.memory_space<vmem>>, %arg4: memref<8x1xi32, #tpu.memory_space<vmem>>, %arg5: memref<1x128xi32, #tpu.memory_space<vmem>>, %arg6: memref<1x128xi32, #tpu.memory_space<vmem>>) attributes {dimension_semantics = [#tpu.dimension_semantics<parallel>, #tpu.dimension_semantics<arbitrary>], iteration_bounds = array<i64: 1, 1>, scalar_prefetch = 0 : i64, scratch_operands = 1 : i64, tpu.core_type = #tpu.core_type<tc>, window_params = [{pipeline_mode = #tpu.pipeline_mode<synchronous>, transform_indices = @transform_0, window_bounds = array<i64: 1, 128>}, {transform_indices = @transform_1, window_bounds = array<i64: 8, 32>}, {transform_indices = @transform_2, window_bounds = array<i64: 8, 1>}, {transform_indices = @transform_3, window_bounds = array<i64: 1, 128>}]} {
    %c0_i32 = arith.constant 0 : i32
    %0 = arith.cmpi eq, %arg1, %c0_i32 : i32
    %1 = arith.extui %0 : i1 to i32
    %c0_i32_0 = arith.constant 0 : i32
    %2 = arith.cmpi ne, %1, %c0_i32_0 : i32
    scf.if %2 {
      %c0_i32_15 = arith.constant 0 : i32
      %36 = vector.broadcast %c0_i32_15 : i32 to vector<1x128xi32>
      %c0_16 = arith.constant 0 : index
      %c0_17 = arith.constant 0 : index
      %37 = vector.load %arg6[%c0_16, %c0_17] : memref<1x128xi32, #tpu.memory_space<vmem>>, vector<1x128xi32>
      tpu.vector_store %arg6[%c0_16, %c0_17], %36 {strides = array<i32>} : memref<1x128xi32, #tpu.memory_space<vmem>>, vector<1x128xi32>,
    } else {
    }
    %c0 = arith.constant 0 : index
    %c0_1 = arith.constant 0 : index
    %3 = vector.load %arg3[%c0, %c0_1] : memref<8x32xf32, #tpu.memory_space<vmem>>, vector<8x32xf32>
    %c0_2 = arith.constant 0 : index
    %c0_3 = arith.constant 0 : index
    %4 = vector.load %arg4[%c0_2, %c0_3] : memref<8x1xi32, #tpu.memory_space<vmem>>, vector<8x1xi32>
    %5 = tpu.iota {dimensions = array<i32: 1>} : vector<8x32xi32>
    %6 = vector.broadcast %4 : vector<8x1xi32> to vector<8x32xi32>
    %7 = arith.cmpi eq, %5, %6 : vector<8x32xi32>
    %cst = arith.constant 0.000000e+00 : f32
    %8 = vector.broadcast %cst : f32 to vector<8x32xf32>
    %9 = arith.select %7, %3, %8 : vector<8x32xi1>, vector<8x32xf32>
    %cst_4 = arith.constant dense<0.000000e+00> : vector<8xf32>
    %10 = vector.multi_reduction <add>, %9, %cst_4 [1] : vector<8x32xf32> to vector<8xf32>
    %11 = vector.shape_cast %10 : vector<8xf32> to vector<8x1xf32>
    %12 = vector.broadcast %11 : vector<8x1xf32> to vector<8x32xf32>
    %13 = arith.cmpf ogt, %3, %12 : vector<8x32xf32>
    %14 = vector.broadcast %11 : vector<8x1xf32> to vector<8x32xf32>
    %15 = arith.cmpf oeq, %3, %14 : vector<8x32xf32>
    %16 = vector.broadcast %4 : vector<8x1xi32> to vector<8x32xi32>
    %17 = arith.cmpi slt, %5, %16 : vector<8x32xi32>
    %18 = arith.andi %15, %17 : vector<8x32xi1>
    %19 = arith.ori %13, %18 : vector<8x32xi1>
    %20 = arith.extui %19 : vector<8x32xi1> to vector<8x32xi32>
    %cst_5 = arith.constant dense<0> : vector<8xi32>
    %21 = vector.multi_reduction <add>, %20, %cst_5 [1] : vector<8x32xi32> to vector<8xi32>
    %22 = vector.shape_cast %21 : vector<8xi32> to vector<8x1xi32>
    %c0_6 = arith.constant 0 : index
    %c0_7 = arith.constant 0 : index
    %23 = vector.load %arg2[%c0_6, %c0_7] : memref<1x128xi32, #tpu.memory_space<vmem>>, vector<1x128xi32>
    %24 = vector.broadcast %22 : vector<8x1xi32> to vector<8x128xi32>
    %25 = vector.broadcast %23 : vector<1x128xi32> to vector<8x128xi32>
    %26 = arith.cmpi slt, %24, %25 : vector<8x128xi32>
    %c0_8 = arith.constant 0 : index
    %c0_9 = arith.constant 0 : index
    %27 = vector.load %arg6[%c0_8, %c0_9] : memref<1x128xi32, #tpu.memory_space<vmem>>, vector<1x128xi32>
    %28 = arith.extui %26 : vector<8x128xi1> to vector<8x128xi32>
    %cst_10 = arith.constant dense<0> : vector<128xi32>
    %29 = vector.multi_reduction <add>, %28, %cst_10 [0] : vector<8x128xi32> to vector<128xi32>
    %30 = vector.shape_cast %29 : vector<128xi32> to vector<1x128xi32>
    %31 = arith.addi %27, %30 : vector<1x128xi32>
    %c0_11 = arith.constant 0 : index
    %c0_12 = arith.constant 0 : index
    %32 = vector.load %arg6[%c0_11, %c0_12] : memref<1x128xi32, #tpu.memory_space<vmem>>, vector<1x128xi32>
    tpu.vector_store %arg6[%c0_11, %c0_12], %31 {strides = array<i32>} : memref<1x128xi32, #tpu.memory_space<vmem>>, vector<1x128xi32>,
    %c0_i32_13 = arith.constant 0 : i32
    %33 = arith.cmpi eq, %arg1, %c0_i32_13 : i32
    %34 = arith.extui %33 : i1 to i32
    %c0_i32_14 = arith.constant 0 : i32
    %35 = arith.cmpi ne, %34, %c0_i32_14 : i32
    scf.if %35 {
      %c0_15 = arith.constant 0 : index
      %c0_16 = arith.constant 0 : index
      %36 = vector.load %arg6[%c0_15, %c0_16] : memref<1x128xi32, #tpu.memory_space<vmem>>, vector<1x128xi32>
      %c0_17 = arith.constant 0 : index
      %c0_18 = arith.constant 0 : index
      %37 = vector.load %arg5[%c0_17, %c0_18] : memref<1x128xi32, #tpu.memory_space<vmem>>, vector<1x128xi32>
      tpu.vector_store %arg5[%c0_17, %c0_18], %36 {strides = array<i32>} : memref<1x128xi32, #tpu.memory_space<vmem>>, vector<1x128xi32>,
    } else {
    }
    return
  }
  func.func @transform_0(%arg0: i32, %arg1: i32) -> (i32, i32) {
    %c0_i32 = arith.constant 0 : i32
    %c0_i32_0 = arith.constant 0 : i32
    %c0_i32_1 = arith.constant 0 : i32
    return %c0_i32, %c0_i32_0 : i32, i32
  }
  func.func @transform_1(%arg0: i32, %arg1: i32) -> (i32, i32) {
    %c1_i32 = arith.constant 1 : i32
    %0 = arith.muli %arg0, %c1_i32 : i32
    %1 = arith.addi %0, %arg1 : i32
    %c0_i32 = arith.constant 0 : i32
    %2 = arith.minsi %1, %c0_i32 : i32
    %c0_i32_0 = arith.constant 0 : i32
    %c0_i32_1 = arith.constant 0 : i32
    return %2, %c0_i32_0 : i32, i32
  }
  func.func @transform_2(%arg0: i32, %arg1: i32) -> (i32, i32) {
    %c1_i32 = arith.constant 1 : i32
    %0 = arith.muli %arg0, %c1_i32 : i32
    %1 = arith.addi %0, %arg1 : i32
    %c0_i32 = arith.constant 0 : i32
    %2 = arith.minsi %1, %c0_i32 : i32
    %c0_i32_0 = arith.constant 0 : i32
    %c0_i32_1 = arith.constant 0 : i32
    return %2, %c0_i32_0 : i32, i32
  }
  func.func @transform_3(%arg0: i32, %arg1: i32) -> (i32, i32) {
    %c0_i32 = arith.constant 0 : i32
    %c0_i32_0 = arith.constant 0 : i32
    return %c0_i32, %arg0 : i32, i32
  }
}

</mosaic_0001>

<bundles_post_ra>
// kernel: tpu_custom_call.1
= control target key start
LH: loop header
LB: loop body
LE: loop exit
PB: predicated region body
PF: predicated region fallthrough
CT: control target
= control target key end

     0   :  { %s213_s0 = inlined_call_operand.vmem [shape: s32[1,128], index: 0, kind: input, shape index: {}]   ;;  %s214_s1 = inlined_call_operand.vmem [shape: f32[8,32], index: 1, kind: input, shape index: {}]   ;;  %s215_s2 = inlined_call_operand.vmem [shape: s32[8,1], index: 2, kind: input, shape index: {}]   ;;  %s216_s3 = inlined_call_operand.hbm [shape: s32[1,128], index: 3, kind: output, shape index: {}]  }
   0x1   :  { %v75_v0 = vld [vmem:[%s215_s2] sm:$0xff] }
   0x2   :  { %8 = vsyncpa [#allocation4], 0  ;;  %v179_v1 = vmov 0   ;;  %v76_v2 = vlaneseq  ;;  %v74_v4 = vld [vmem:[%s214_s1] sm:$0xff]  ;;  %vm83_vm0 = vcmask 261120   ;;  %s180_s16 = smov [#allocation3]  }
   0x3   :  { %156 = vset.pattern.permute.xlu0 %v179_v1  ;;  %73 = vst [vmem:[#allocation2] sm:$0x1] %v179_v1  ;;  %v153_v20 = vld [vmem:[%s213_s0] ss:$0 sm:$0xff]  ;;  %s133_s17 = sshll.u32 %s180_s16, 4  ;;  %s134_s17 = int_to_ptr.vmem [resolvable:$true] %s133_s17 }
   0x4   :  { %79 = vperm.xlu0 %156, %v75_v0   ;;  %v77_v3 = vand.u32 127, %v76_v2  ;;  %s157_s18 = scalar_lea.vmem %s134_s17, 16  ;;  %s161_s0 = scalar_lea.vmem %s134_s17, 32 }
   0x5   :  { %p158_p0 = scmp.ne.s32.totalorder %s134_s17, %s157_s18  ;;  %p162_p1 = scmp.lt.s32.totalorder %s134_s17, %s134_s17 }
   0x6   :  { %p163_p2 = scmp.lt.s32.totalorder %s161_s0, %s157_s18 }
   0x8   :  { %p164_p3 = por %p163_p2, %p162_p1 }
   0xa   :  { %v112_v28 = vld [vmem:[#allocation2] sm:$0x1]  ;;  %p165_p4 = pnand %p164_p3, %p158_p0 }
  0x7f   :  { %v80_v5 = vpop.permute.xlu0 %79 }
  0x80   :  { %vm81_vm1 = vcmp.eq.s32.totalorder %v77_v3, %v80_v5  ;;  %vm89_vm2 = vcmp.lt.s32.totalorder %v77_v3, %v80_v5 }
  0x81   :  { %v82_v6 = vsel %vm81_vm1, %v74_v4, 0.0 }
  0x82   :  { %v84_v7 = vsel %vm83_vm0, %v82_v6, 0.0 }
  0x83   :  { %85 = vadd.xlane.f32.xlu0 %v84_v7 }
 0x10c   :  { %v86_v8 = vpop.xlane.xlu0 %85 }
 0x10d   :  { %vm87_vm3 = vcmp.gt.f32.partialorder %v74_v4, %v86_v8  ;;  %vm88_vm4 = vcmp.eq.f32.partialorder %v74_v4, %v86_v8 }
 0x10e   :  { %vm90_vm5 = vmand %vm88_vm4, %vm89_vm2 }
 0x10f   :  { %vm91_vm6 = vmor %vm87_vm3, %vm90_vm5 }
 0x110   :  { %v92_v9 = vsel %vm91_vm6, 1, %v179_v1 }
 0x111   :  { %v93_v10 = vsel %vm83_vm0, %v92_v9, 0 }
 0x112   :  { %v95_v11 = vshrl.u32 %v93_v10, 16  ;;  %v94_v13 = vand.u32 65535, %v93_v10 }
 0x114   :  { %v97_v12 = vcvt.s32.f32 %v95_v11  ;;  %v96_v14 = vcvt.s32.f32 %v94_v13 }
 0x116   :  { %100 = vadd.xlane.f32.xlu1 %v97_v12 }
 0x11a   :  { %98 = vadd.xlane.f32.xlu1 %v96_v14 }
 0x19f   :  { %v101_v15 = vpop.xlane.xlu1 %100 }
 0x1a0   :  { %v103_v16 = vcvt.f32.s32 %v101_v15 }
 0x1a2   :  { %v104_v18 = vshll.u32 %v103_v16, 16 }
 0x1a3   :  { %v99_v17 = vpop.xlane.xlu1 %98 }
 0x1a4   :  { %v102_v19 = vcvt.f32.s32 %v99_v17 }
 0x1a6   :  { %v105_v21 = vadd.s32 %v104_v18, %v102_v19 }
 0x1a8   :  { %vm111_vm7 = vcmp.lt.s32.totalorder %v105_v21, %v153_v20 }
 0x1a9   :  { %v113_v22 = vsel %vm111_vm7, 1, %v179_v1 }
 0x1aa   :  { %v114_v23 = vrot.slane %v113_v22, 4 }
 0x1ac   :  { %v115_v24 = vadd.s32 %v114_v23, %v113_v22 }
 0x1ae   :  { %v116_v25 = vrot.slane %v115_v24, 2 }
 0x1b0   :  { %v117_v26 = vadd.s32 %v116_v25, %v115_v24 }
 0x1b2   :  { %v118_v27 = vrot.slane %v117_v26, 1 }
 0x1b4   :  { %v119_v29 = vadd.s32 %v118_v27, %v117_v26 }
 0x1b6   :  { %v120_v30 = vadd.s32 %v119_v29, %v112_v28 }
 0x1b8   :  { %121 = vst [vmem:[#allocation2] sm:$0x1] %v120_v30 }
 0x1bf   :  { %v125_v31 = vld [vmem:[#allocation2] sm:$0x1] }
 0x1c0   :  { %126 = vst [vmem:[#allocation3] sm:$0x1] %v125_v31 }
 0x1c1   :  { %168 = shalt.err (!%p165_p4)
}
 0x1c2   :  { %136 = dma.vmem_to_hbm [thread:$0]  %s134_s17, 16, %s216_s3, [#allocation4]  }
 0x1c3   :  { %177 = dma.done.wait [#allocation4], 16  }
 0x1c4   :  { %178 = vsyncadd [#allocation4], 4294967280 }
 0x1c5   :  { %140 = vsyncpa [#allocation4], 1 }

</bundles_post_ra>
